<compile_context>
chip_gen: v7x
topology: tpu7x:2x2x1
jax: 0.10.0
libtpu: 0.0.40
codegen_flags: <defaults>
</compile_context>

<pallas_src>
import jax
import jax.numpy as jnp
from jax.experimental import pallas as pl
from jax.experimental.pallas import tpu as pltpu


def pos_emb_kernel(x_ref, pos_ref, o_ref):
    # x_ref:   (TW, TB, H)  tile of the input
    # pos_ref: (TW, 1,  H)  matching window-tile of the positional embedding
    # o_ref:   (TW, TB, H)
    # Broadcast pos over the batch (sublane) dim and add — pure VPU work with
    # hidden on the lane axis, so the store is lane-dense when H % 128 == 0.
    o_ref[...] = x_ref[...] + pos_ref[...]


def _choose_tiles(W, B, H, itemsize):
    """Pick (tile_w, tile_b) so every live double-buffered block fits VMEM."""
    sublane = max(8, 32 // itemsize)          # 8 (f32) / 16 (bf16) / 32 (int8)
    x_row = B * H * itemsize                  # one window slab of x (== out)
    pos_row = sublane * H * itemsize          # (tw,1,H) pos block pads its sublane dim
    budget = 40 << 20                         # headroom under the 48 MiB VMEM limit

    live_per_window = 2 * (2 * x_row + pos_row)   # x, out double-buffered + pos
    if live_per_window <= budget:
        tile_b = B
        tile_w = min(W, max(1, budget // live_per_window))
        # Keep >= ~4 window steps so v7x's two TensorCores both get work and
        # the pipeline has something to overlap (harmless for tiny W).
        tile_w = min(tile_w, max(1, -(-W // 4)))
    else:
        # A single full-batch window slab already exceeds the budget:
        # add a batch grid axis and tile it in sublane-aligned chunks.
        tile_w = 1
        per_b = 2 * 2 * H * itemsize          # x + out per batch row, double buffered
        tile_b = max(1, (budget - 2 * pos_row) // per_b)
        tile_b = min(tile_b, B)
        if tile_b != B:                       # block (tile_b, H) must be sublane-aligned
            tile_b = max(sublane, (tile_b // sublane) * sublane)
    return tile_w, tile_b


def position_emb_forward(x, pos_emb, *, nohistpos=False, donate_x=False):
    """Eval-mode forward of PositionEmb.

    x:       (windows, batch, hidden)
    pos_emb: (windows_max, 1, hidden) with windows_max >= windows
    returns  (windows, batch, hidden)
    """
    if nohistpos:
        # Module returns the input untouched on this branch.
        return x

    W, B, H = x.shape
    Wp, one, Hp = pos_emb.shape
    assert one == 1 and Hp == H and Wp >= W, (pos_emb.shape, x.shape)
    # The parameter table may be allocated for a longer max window; slice it
    # and match x's dtype (bf16 activations halve HBM traffic for this op).
    pos = pos_emb[:W].astype(x.dtype)

    itemsize = jnp.dtype(x.dtype).itemsize
    tile_w, tile_b = _choose_tiles(W, B, H, itemsize)
    grid = (-(-W // tile_w), -(-B // tile_b))

    cost = pl.CostEstimate(
        flops=W * B * H,
        transcendentals=0,
        bytes_accessed=2 * W * B * H * itemsize + W * H * itemsize,
    )

    out = pl.pallas_call(
        pos_emb_kernel,
        out_shape=jax.ShapeDtypeStruct((W, B, H), x.dtype),
        grid_spec=pltpu.PrefetchScalarGridSpec(
            num_scalar_prefetch=0,
            grid=grid,
            in_specs=[
                pl.BlockSpec((tile_w, tile_b, H), lambda i, j: (i, j, 0)),
                pl.BlockSpec((tile_w, 1, H), lambda i, j: (i, 0, 0)),
            ],
            out_specs=pl.BlockSpec((tile_w, tile_b, H), lambda i, j: (i, j, 0)),
        ),
        compiler_params=pltpu.CompilerParams(
            dimension_semantics=("parallel", "parallel"),
            vmem_limit_bytes=48 << 20,
        ),
        cost_estimate=cost,
        # If x is dead after this op, aliasing saves the extra HBM allocation.
        input_output_aliases={0: 0} if donate_x else {},
    )(x, pos)

    # TODO(synk): training-mode dropout would add pltpu.prng_seed +
    # pltpu.stateful_bernoulli masking here; eval mode is identity.
    # TODO(synk): for B < 8 (f32) / 16 (bf16) or H not a multiple of 128 the
    # layout is sublane/lane-sparse; the real fix is upstream (batch-major or
    # lane-padded activations) or fusing this add into the producer kernel —
    # that also removes this op's full HBM round trip entirely.
    return out


def reference_forward(x, pos_emb, *, nohistpos=False):
    """Pure-JAX/XLA replica of the PyTorch forward, for checking."""
    if nohistpos:
        return x
    W = x.shape[0]
    return x + jnp.broadcast_to(pos_emb[:W].astype(x.dtype), x.shape)


if __name__ == "__main__":
    # Small shapes consistent with the module: windows (seq) = 8, batch = 2,
    # hidden = 32.
    W, B, H = 8, 2, 32

    key = jax.random.PRNGKey(0)
    k_x, k_p = jax.random.split(key, 2)
    x = jax.random.normal(k_x, (W, B, H), jnp.float32)
    pos_emb = jax.random.normal(k_p, (W, 1, H), jnp.float32) * 0.1

    # nohistpos = False path (the real kernel).
    out = position_emb_forward(x, pos_emb, nohistpos=False)
    jax.block_until_ready(out)
    ref = reference_forward(x, pos_emb, nohistpos=False)
    assert out.shape == (W, B, H)
    assert jnp.allclose(out, ref, rtol=1e-6, atol=1e-6)

    # nohistpos = True path (identity).
    out_id = position_emb_forward(x, pos_emb, nohistpos=True)
    assert jnp.allclose(out_id, x)

    print("KERNEL_OK")
</pallas_src>

<mosaic_0001>
module attributes {stable_mosaic.version = 11 : i64} {
  func.func @pos_emb_kernel(%arg0: i32, %arg1: i32, %arg2: memref<2x2x32xf32, #tpu.memory_space<vmem>>, %arg3: memref<2x1x32xf32, #tpu.memory_space<vmem>>, %arg4: memref<2x2x32xf32, #tpu.memory_space<vmem>>) attributes {dimension_semantics = [#tpu.dimension_semantics<parallel>, #tpu.dimension_semantics<parallel>], iteration_bounds = array<i64: 4, 1>, scalar_prefetch = 0 : i64, scratch_operands = 0 : i64, tpu.core_type = #tpu.core_type<tc>, window_params = [{transform_indices = @transform_0, window_bounds = array<i64: 2, 2, 32>}, {transform_indices = @transform_1, window_bounds = array<i64: 2, 1, 32>}, {transform_indices = @transform_2, window_bounds = array<i64: 2, 2, 32>}]} {
    %c0 = arith.constant 0 : index
    %c0_0 = arith.constant 0 : index
    %c0_1 = arith.constant 0 : index
    %0 = vector.load %arg2[%c0, %c0_0, %c0_1] : memref<2x2x32xf32, #tpu.memory_space<vmem>>, vector<2x2x32xf32>
    %c0_2 = arith.constant 0 : index
    %c0_3 = arith.constant 0 : index
    %c0_4 = arith.constant 0 : index
    %1 = vector.load %arg3[%c0_2, %c0_3, %c0_4] : memref<2x1x32xf32, #tpu.memory_space<vmem>>, vector<2x1x32xf32>
    %2 = vector.broadcast %1 : vector<2x1x32xf32> to vector<2x2x32xf32>
    %3 = arith.addf %0, %2 : vector<2x2x32xf32>
    %c0_5 = arith.constant 0 : index
    %c0_6 = arith.constant 0 : index
    %c0_7 = arith.constant 0 : index
    %4 = vector.load %arg4[%c0_5, %c0_6, %c0_7] : memref<2x2x32xf32, #tpu.memory_space<vmem>>, vector<2x2x32xf32>
    tpu.vector_store %arg4[%c0_5, %c0_6, %c0_7], %3 {strides = array<i32>} : memref<2x2x32xf32, #tpu.memory_space<vmem>>, vector<2x2x32xf32>,
    return
  }
  func.func @transform_0(%arg0: i32, %arg1: i32) -> (i32, i32, i32) {
    %c0_i32 = arith.constant 0 : i32
    %c0_i32_0 = arith.constant 0 : i32
    return %arg0, %arg1, %c0_i32 : i32, i32, i32
  }
  func.func @transform_1(%arg0: i32, %arg1: i32) -> (i32, i32, i32) {
    %c0_i32 = arith.constant 0 : i32
    %c0_i32_0 = arith.constant 0 : i32
    %c0_i32_1 = arith.constant 0 : i32
    return %arg0, %c0_i32, %c0_i32_0 : i32, i32, i32
  }
  func.func @transform_2(%arg0: i32, %arg1: i32) -> (i32, i32, i32) {
    %c0_i32 = arith.constant 0 : i32
    %c0_i32_0 = arith.constant 0 : i32
    return %arg0, %arg1, %c0_i32 : i32, i32, i32
  }
}

</mosaic_0001>

<bundles_post_ra>
// kernel: tpu_custom_call.1
= control target key start
LH: loop header
LB: loop body
LE: loop exit
PB: predicated region body
PF: predicated region fallthrough
CT: control target
= control target key end

     0   :  { %7 = vsyncpa [#allocation3], 0  ;;  %s858_s0 = inlined_call_operand.hbm [shape: f32[8,2,32], index: 0, kind: input, shape index: {}]   ;;  %s859_s1 = inlined_call_operand.hbm [shape: f32[8,1,32], index: 1, kind: input, shape index: {}]   ;;  %s860_s2 = inlined_call_operand.hbm [shape: f32[8,2,32], index: 2, kind: output, shape index: {}]  }
   0x1   :  { %9 = vsyncpa [#allocation3 + $0x1], 0 }
   0x2   :  { %10 = vsyncpa [#allocation6], 0 }
   0x3   :  { %12 = vsyncpa [#allocation6 + $0x1], 0 }
   0x4   :  { %13 = vsyncpa [#allocation4], 0 }
   0x5   :  { %15 = vsyncpa [#allocation4 + $0x1], 0  ;;  %s635_s9 = smov 0   ;;  %s637_s10 = smov 0  }
   0x6   :  { %s639_s11 = smov 0   ;;  %s641_s12 = smov 0  }
   0x7   :  { %s643_s13 = smov 0   ;;  %s645_s14 = smov 0  }
   0x8 LB: > { %s366_s15 = sadd.s32 4294967295, %s609_s14   ;;  %s367_s16 = sadd.s32 4294967294, %s609_s14   ;;  %s609_s14 = sphi %s645_s14, %s21_s14   ;;  %s605_s13 = sphi %s643_s13, %s877_s13   ;;  %s601_s12 = sphi %s641_s12, %s876_s12   ;;  %s597_s11 = sphi %s639_s11, %s875_s11   ;;  %s593_s10 = sphi %s637_s10, %s874_s10   ;;  %s589_s9 = sphi %s635_s9, %s873_s9  }
   0x9   : > { %s33_s17 = sadd.s32 1, %s605_s13  ;;  %s42_s18 = sadd.s32 1, %s597_s11 }
   0xa   : > { %p35_p0 = scmp.ge.s32.totalorder %s33_s17, 4  ;;  %p49_p1 = scmp.ne.s32.totalorder %s597_s11, %s593_s10 }
   0xb   : > { %p50_p2 = scmp.eq.s32.totalorder %s609_s14, 0  ;;  %p55_p3 = scmp.ne.s32.totalorder %s593_s10, %s589_s9 }
   0xc   : > { %s879_s17 = smov (%p35_p0, %s33_s17), 0  ;;  %p56_p5 = scmp.eq.s32.totalorder %s366_s15, 0 }
   0xd   : > { %p676_p4 = por %p50_p2, %p49_p1  ;;  %s37_s20 = ssub.s32 %s605_s13, %s879_s17 }
   0xe   : > { %p107_p6 = scmp.eq.s32.totalorder %s366_s15, 3  ;;  %p40_p7 = scmp.eq.s32.totalorder %s37_s20, 0 }
   0xf   : > { %p682_p8 = por %p56_p5, %p55_p3  ;;  %p113_p10 = scmp.eq.s32.totalorder %s367_s16, 3 }
  0x10   : > { %p686_p9 = por %p107_p6, %p49_p1  ;;  %p407_p12 = scmp.lt.s32.totalorder %s609_s14, 4 }
  0x11   : > { %s864_s21 = scalar_select %p682_p8, 1, 0 }
  0x12   : > { %s865_s22 = scalar_select %p686_p9, 1, 0 }
  0x13   : > { %s691_s23 = scalar_select %p40_p7, %s597_s11, %s42_s18  }
  0x14   : > { %p693_p11 = por %p113_p10, %p55_p3  ;;  %s699_s25 = sand.u32 1, %s597_s11  }
  0x15   : > { %s370_s26 = sshll.u32 %s699_s25, 2  ;;  %s387_s27 = sshll.u32 %s605_s13, 6 }
  0x16   : > { %s866_s24 = scalar_select %p693_p11, 1, 0 }
  0x17   : > { %s706_s30 = scalar_lea.hbm %s858_s0, %s387_s27  ;;  %s137_s3 = scalar_lea.vmem [#allocation2], %s370_s26 }
  0x18   : > { %s145_s4 = sshll.u32 %s137_s3, 4  ;;  %p712_p13 = pnand %p407_p12, %p676_p4  ;;  %s708_s4 = int_to_ptr.vmem [resolvable:$true] %s145_s4 }
  0x19   : > { %s134_s6 = scalar_lea.sflag [#allocation3], %s699_s25  ;;  %s463_s7 = scalar_lea.hbm %s706_s30, 64 }
  0x1a   : > { %p464_p1 = scmp.ne.s32.totalorder %s706_s30, %s463_s7  ;;  %p465_p2 = pneg %p712_p13 }
  0x1b   : > { %s468_s16 = scalar_lea.hbm %s858_s0, 256  ;;  %p469_p4 = scmp.lt.u32.totalorder %s706_s30, %s858_s0 }
  0x1c   : > { %p466_p3 = pnand %p465_p2, %p464_p1  ;;  %p470_p6 = scmp.lt.u32.totalorder %s468_s16, %s463_s7 }
  0x1d   : > { %p472_p10 = scmp.lt.u32.totalorder %s463_s7, %s706_s30 }
  0x1e   : > { %p467_p5 = pneg %p466_p3  ;;  %p471_p7 = por %p470_p6, %p469_p4 }
  0x20   : > { %p473_p12 = por %p472_p10, %p471_p7 }
  0x22   : > { %p474_p0 = pnand %p473_p12, %p467_p5 }
  0x24   : > { %477 = shalt.err (!%p474_p0)
}
  0x25   : > { %s478_s20 = scalar_lea.vmem %s708_s4, 64  ;;  %s611_s26 = smov [#allocation2]  }
  0x26   : > { %p479_p1 = scmp.ne.s32.totalorder %s708_s4, %s478_s20  ;;  %s483_s27 = sshll.u32 %s611_s26, 4  ;;  %s484_s27 = int_to_ptr.vmem [resolvable:$false] %s483_s27 }
  0x27   : > { %s485_s28 = scalar_lea.vmem %s484_s27, 128  ;;  %p486_p9 = scmp.lt.s32.totalorder %s708_s4, %s484_s27 }
  0x28   : > { %p481_p3 = pnand %p479_p1, %p465_p2  ;;  %p487_p4 = scmp.lt.s32.totalorder %s485_s28, %s478_s20 }
  0x2a   : > { %p482_p11 = pneg %p481_p3  ;;  %p488_p6 = por %p487_p4, %p486_p9 }
  0x2c   : > { %p489_p7 = pnand %p488_p6, %p482_p11 }
  0x2e   : > { %492 = shalt.err (!%p489_p7)
}
  0x2f   : > { %s612_s29 = smov 32   ;;  %s613_s3 = smov 2  }
  0x30   : > { %399 = dma.hbm_to_vmem [thread:$0]  (!%p712_p13), %s706_s30, 64, %s708_s4, %s134_s6, %s612_s29, %s612_s29, %s613_s3  }
  0x31   : > { %p174_p0 = scmp.lt.s32.totalorder %s609_s14, 5  ;;  %s373_s7 = sshll.u32 %s699_s25, 1 }
  0x32   : > { %s388_s8 = sshll.u32 %s605_s13, 5  ;;  %p868_p9 = scmp.ge.s32.totalorder %s609_s14, 1 }
  0x33   : > { %s757_s19 = scalar_lea.hbm %s859_s1, %s388_s8  ;;  %s159_s20 = scalar_lea.vmem [#allocation5], %s373_s7 }
  0x34   : > { %p750_p11 = pnand %p868_p9, %p174_p0  ;;  %s166_s26 = sshll.u32 %s159_s20, 4  ;;  %s759_s26 = int_to_ptr.vmem [resolvable:$true] %s166_s26 }
  0x35   : > { %s156_s30 = scalar_lea.sflag [#allocation6], %s699_s25  ;;  %s493_s4 = scalar_lea.hbm %s757_s19, 32 }
  0x36   : > { %p494_p5 = scmp.ne.s32.totalorder %s757_s19, %s493_s4  ;;  %s498_s28 = scalar_lea.hbm %s859_s1, 128 }
  0x37   : > { %p499_p1 = scmp.lt.u32.totalorder %s757_s19, %s859_s1  ;;  %p500_p3 = scmp.lt.u32.totalorder %s498_s28, %s493_s4 }
  0x38   : > { %p496_p10 = pnand %p494_p5, %p465_p2  ;;  %p502_p6 = scmp.lt.u32.totalorder %s493_s4, %s757_s19 }
  0x39   : > { %p501_p4 = por %p500_p3, %p499_p1 }
  0x3a   : > { %p497_p12 = pneg %p496_p10 }
  0x3b   : > { %p503_p7 = por %p502_p6, %p501_p4 }
  0x3d   : > { %p504_p0 = pnand %p503_p7, %p497_p12 }
  0x3f   : > { %507 = shalt.err (!%p504_p0)
}
  0x40   : > { %s508_s7 = scalar_lea.vmem %s759_s26, 32  ;;  %s614_s8 = smov [#allocation5]  }
  0x41   : > { %p509_p9 = scmp.ne.s32.totalorder %s759_s26, %s508_s7  ;;  %s513_s16 = sshll.u32 %s614_s8, 4  ;;  %s514_s16 = int_to_ptr.vmem [resolvable:$false] %s513_s16 }
  0x42   : > { %s515_s18 = scalar_lea.vmem %s514_s16, 64  ;;  %p516_p8 = scmp.lt.s32.totalorder %s759_s26, %s514_s16 }
  0x43   : > { %p511_p5 = pnand %p509_p9, %p465_p2  ;;  %p517_p1 = scmp.lt.s32.totalorder %s515_s18, %s508_s7 }
  0x45   : > { %p512_p10 = pneg %p511_p5  ;;  %p518_p3 = por %p517_p1, %p516_p8 }
  0x47   : > { %p519_p4 = pnand %p518_p3, %p512_p10 }
  0x49   : > { %522 = shalt.err (!%p519_p4)
}
  0x4a   : > { %s615_s20 = smov 16   ;;  %s616_s4 = smov 1  }
  0x4b   : > { %402 = dma.hbm_to_vmem [thread:$0]  (!%p712_p13), %s757_s19, 32, %s759_s26, %s156_s30, %s615_s20, %s615_s20, %s616_s4  }
  0x4c   : > { %178 = sbr.rel (%p750_p11) target bundleno = 114 (0x72), region = 28  ;;  %s790_s6 = sand.u32 (!%p750_p11), 1, %s593_s10  }
  0x4d   : > { %s377_s27 = sshll.u32 (!%p750_p11), %s790_s6, 2  ;;  %s181_s28 = scalar_lea.sflag (!%p750_p11), [#allocation3], %s790_s6 }
  0x4e   : > { %s184_s29 = scalar_lea.vmem (!%p750_p11), [#allocation2], %s377_s27  ;;  %p870_p8 = scmp.ne.s32.totalorder (!%p750_p11), %s864_s21, 0 }
  0x53   : > { %576 = dma.done.wait (%p870_p8), %s181_s28, 64  }
  0x54   : > { %578 = vsyncadd (%p870_p8), %s181_s28, 4294967232  ;;  %s378_s25 = sshll.u32 %s790_s6, 1  ;;  %s190_s5 = scalar_lea.sflag [#allocation6], %s790_s6 }
  0x55   : > { %s193_s15 = scalar_lea.vmem [#allocation5], %s378_s25 }
  0x56   : > { %580 = dma.done.wait (%p870_p8), %s190_s5, 32  }
  0x57   : > { %582 = vsyncadd (%p870_p8), %s190_s5, 4294967264  ;;  %s218_s19 = scalar_lea.vmem [#allocation7], %s377_s27  ;;  %s389_s30 = sshll.u32 %s601_s12, 6  ;;  %vm240_vm0 = vcmask 254976   ;;  %v222_v0 = vld [vmem:[%s184_s29] sm:$0x3] }
  0x58   : > { %s258_s26 = sshll.u32 %s218_s19, 4  ;;  %v380_v1 = vld [vmem:[%s193_s15] ss:$0 sm:$0xff]  ;;  %v223_v2 = vld [vmem:[%s184_s29 + $0x2] sm:$0x3]  ;;  %s810_s7 = scalar_lea.hbm %s860_s2, %s389_s30  ;;  %s805_s26 = int_to_ptr.vmem [resolvable:$true] %s258_s26 }
  0x59   : > { %v238_v3 = vadd.f32 %v380_v1, %v222_v0  ;;  %v381_v4 = vld [vmem:[%s193_s15 + $0x1] ss:$0 sm:$0xff]  ;;  %s244_s12 = scalar_lea.sflag [#allocation4], %s790_s6  ;;  %s523_s8 = scalar_lea.vmem %s805_s26, 64 }
  0x5a   : > { %v239_v5 = vadd.f32 %v381_v4, %v223_v2  ;;  %p524_p13 = scmp.ne.s32.totalorder %s805_s26, %s523_s8  ;;  %p871_p2 = scmp.ne.s32.totalorder %s865_s22, 0 }
  0x5b   : > { %241 = vst.msk [vmem:[%s218_s19] sm:$0x3] %vm240_vm0, %v238_v3  ;;  %s617_s16 = smov [#allocation7]  }
  0x5c   : > { %242 = vst.msk [vmem:[%s218_s19 + $0x2] sm:$0x3] %vm240_vm0, %v239_v5  ;;  %p525_p11 = pnand %p524_p13, %p871_p2  ;;  %s527_s18 = sshll.u32 %s617_s16, 4  ;;  %s528_s18 = int_to_ptr.vmem [resolvable:$false] %s527_s18 }
  0x5d   : > { %s529_s20 = scalar_lea.vmem %s528_s18, 128  ;;  %p530_p6 = scmp.lt.s32.totalorder %s805_s26, %s528_s18 }
  0x5e   : > { %p526_p12 = pneg %p525_p11  ;;  %p531_p7 = scmp.lt.s32.totalorder %s529_s20, %s523_s8 }
  0x60   : > { %p532_p0 = por %p531_p7, %p530_p6 }
  0x62   : > { %p533_p9 = pnand %p532_p0, %p526_p12 }
  0x64   : > { %536 = shalt.err (!%p533_p9)
}
  0x65   : > { %s537_s4 = scalar_lea.hbm %s810_s7, 64  ;;  %s541_s29 = scalar_lea.hbm %s860_s2, 256 }
  0x66   : > { %p538_p5 = scmp.ne.s32.totalorder %s810_s7, %s537_s4  ;;  %p542_p3 = scmp.lt.u32.totalorder %s810_s7, %s860_s2 }
  0x67   : > { %p543_p4 = scmp.lt.u32.totalorder %s541_s29, %s537_s4  ;;  %p545_p13 = scmp.lt.u32.totalorder %s537_s4, %s810_s7 }
  0x68   : > { %p539_p10 = pnand %p538_p5, %p871_p2 }
  0x69   : > { %p544_p8 = por %p543_p4, %p542_p3 }
  0x6a   : > { %p540_p1 = pneg %p539_p10 }
  0x6b   : > { %p546_p11 = por %p545_p13, %p544_p8 }
  0x6d   : > { %p547_p12 = pnand %p546_p11, %p540_p1 }
  0x6f   : > { %550 = shalt.err (!%p547_p12)
}
  0x70   : > { %s618_s15 = smov 32   ;;  %s619_s19 = smov 2  }
  0x71   : > { %394 = dma.vmem_to_hbm [thread:$0]  (%p871_p2), %s805_s26, 64, %s810_s7, %s244_s12, %s618_s15, %s618_s15, %s619_s19  }
  0x72 PF: > { %p408_p6 = scmp.ge.s32.totalorder %s609_s14, 2  ;;  %s273_s30 = sand.u32 1, %s589_s9  }
  0x73   : > { %p872_p7 = scmp.ne.s32.totalorder %s866_s24, 0  ;;  %s274_s3 = scalar_lea.sflag [#allocation4], %s273_s30 }
  0x75   : > { %p404_p0 = pnand %p408_p6, %p872_p7 }
  0x77   : > { %584 = dma.done.wait (!%p404_p0), %s274_s3, 64  }
  0x78   : > { %586 = vsyncadd (!%p404_p0), %s274_s3, 4294967232  ;;  %s21_s14 = sadd.s32 1, %s609_s14   ;;  %s873_s9 = smov %s593_s10 }
  0x79   : > { %p18_p9 = scmp.ge.s32.totalorder %s21_s14, 6   ;;  %s874_s10 = smov %s597_s11 }
  0x7a   : > { %s875_s11 = smov %s691_s23  ;;  %s876_s12 = smov %s605_s13 }
  0x7b   : > { %s877_s13 = smov %s879_s17  ;;  %20 = sbr.rel (!%p18_p9) target bundleno = 8 (0x8), region = 86 }
  0x82   :  { %279 = vsyncpa [#allocation3], 1 }
  0x83   :  { %281 = vsyncpa [#allocation3 + $0x1], 1 }
  0x84   :  { %282 = vsyncpa [#allocation6], 1 }
  0x85   :  { %284 = vsyncpa [#allocation6 + $0x1], 1 }
  0x86   :  { %285 = vsyncpa [#allocation4], 1 }
  0x87   :  { %287 = vsyncpa [#allocation4 + $0x1], 1 }

</bundles_post_ra>
